<compile_context>
chip_gen: v7x
topology: tpu7x:2x2x1
jax: 0.10.0
libtpu: 0.0.40
codegen_flags: <defaults>
</compile_context>

<pallas_src>
import functools

import jax
import jax.numpy as jnp
from jax.experimental import pallas as pl
from jax.experimental.pallas import tpu as pltpu


def _encoder_mlp_kernel(x_ref, w1_ref, b1_ref, w2_ref, b2_ref, w3_ref, b3_ref,
                        o_ref):
    """Fused 3-layer MLP: (Linear+ReLU) -> (Linear+ReLU) -> Linear."""
    cdt = w1_ref.dtype  # matmul operand dtype (f32 or bf16); accum stays f32.
    # Explicit in-kernel cast of x keeps the bf16 MXU path (otherwise jnp.dot
    # promotes W1 to f32).  For the f32 path this astype is a no-op.
    h = jnp.dot(x_ref[...].astype(cdt), w1_ref[...],
                preferred_element_type=jnp.float32)
    h = jnp.maximum(h + b1_ref[...], 0.0)                      # f32 VPU path
    h = jnp.dot(h.astype(cdt), w2_ref[...], preferred_element_type=jnp.float32)
    h = jnp.maximum(h + b2_ref[...], 0.0)
    out = jnp.dot(h.astype(cdt), w3_ref[...], preferred_element_type=jnp.float32)
    out = out + b3_ref[...]
    o_ref[...] = out.astype(o_ref.dtype)


def _round_up(n, m):
    return ((n + m - 1) // m) * m


@functools.partial(jax.jit,
                   static_argnames=("block_b", "compute_dtype", "out_dtype"))
def encoder_mlp(x, w1, b1, w2, b2, w3, b3, *, block_b=None,
                compute_dtype=jnp.float32, out_dtype=None):
    """x: (B, input_dim). Weights are (in, out); biases (1, out).

    compute_dtype=jnp.bfloat16 is recommended on all generations (v5e/v6e/v7x):
    only the MXU sees bf16 operands, accumulation + bias/ReLU stay f32.  Keep
    f32 when bit-exactness vs. the PyTorch reference matters.
    out_dtype=jnp.bfloat16 additionally halves the output writeback if the
    consumer tolerates bf16 activations.
    """
    B, input_dim = x.shape
    hidden_dim = w1.shape[1]
    output_dim = w3.shape[1]
    if out_dtype is None:
        out_dtype = x.dtype

    # ---- batch tile: >=4 grid steps (feeds both v7x TCs + pipeline warmup),
    #      multiple of 8 sublanes, capped at 512.  Sweep higher for huge B. ----
    if block_b is None:
        block_b = min(512, _round_up(pl.cdiv(B, 4), 8))

    # ---- dtype plumbing: weights in compute_dtype (tiny, one-time cast),
    #      biases in f32, x passed through untouched (cast happens in-kernel). --
    w1c, w2c, w3c = (w.astype(compute_dtype) for w in (w1, w2, w3))
    b1f, b2f, b3f = (b.astype(jnp.float32) for b in (b1, b2, b3))

    grid = (pl.cdiv(B, block_b),)
    resident = dict(pipeline_mode=pl.Buffered(1))  # constant index_map, 1 buf

    out = pl.pallas_call(
        _encoder_mlp_kernel,
        out_shape=jax.ShapeDtypeStruct((B, output_dim), out_dtype),
        grid_spec=pltpu.PrefetchScalarGridSpec(
            num_scalar_prefetch=0,
            grid=grid,
            in_specs=[
                # streamed per batch tile (double-buffered by default)
                pl.BlockSpec((block_b, input_dim), lambda i: (i, 0)),
                # resident weights/biases: constant index_map, single buffer
                pl.BlockSpec((input_dim, hidden_dim), lambda i: (0, 0), **resident),
                pl.BlockSpec((1, hidden_dim), lambda i: (0, 0), **resident),
                pl.BlockSpec((hidden_dim, hidden_dim), lambda i: (0, 0), **resident),
                pl.BlockSpec((1, hidden_dim), lambda i: (0, 0), **resident),
                pl.BlockSpec((hidden_dim, output_dim), lambda i: (0, 0), **resident),
                pl.BlockSpec((1, output_dim), lambda i: (0, 0), **resident),
            ],
            # Last block dim equals the full array width (16): legal under the
            # (8,128) rule and each output tile is one contiguous HBM DMA.
            out_specs=pl.BlockSpec((block_b, output_dim), lambda i: (i, 0)),
        ),
        compiler_params=pltpu.CompilerParams(
            dimension_semantics=("parallel",)),
    )(x, w1c, b1f, w2c, b2f, w3c, b3f)

    return out


def _reference(x, w1, b1, w2, b2, w3, b3):
    h = jnp.maximum(x @ w1 + b1, 0.0)
    h = jnp.maximum(h @ w2 + b2, 0.0)
    return h @ w3 + b3


if __name__ == "__main__":
    # EncoderMLP defaults: output_dim=16, hidden_dim=128, layer_num=1.
    input_dim = 32
    hidden_dim = 128
    output_dim = 16
    batch = 64          # small demo batch; default block_b=16 -> 4 grid steps

    key = jax.random.PRNGKey(0)
    kx, k1, k2, k3, kb1, kb2, kb3 = jax.random.split(key, 7)

    # PyTorch Linear stores W as (out, in) and computes x @ W^T; here we build
    # the transposed (in, out) matrices directly — semantics are identical.
    x = jax.random.normal(kx, (batch, input_dim), dtype=jnp.float32)
    w1 = jax.random.normal(k1, (input_dim, hidden_dim), jnp.float32) * 0.05
    b1 = jax.random.normal(kb1, (1, hidden_dim), jnp.float32) * 0.01
    w2 = jax.random.normal(k2, (hidden_dim, hidden_dim), jnp.float32) * 0.05
    b2 = jax.random.normal(kb2, (1, hidden_dim), jnp.float32) * 0.01
    w3 = jax.random.normal(k3, (hidden_dim, output_dim), jnp.float32) * 0.05
    b3 = jax.random.normal(kb3, (1, output_dim), jnp.float32) * 0.01

    ref = _reference(x, w1, b1, w2, b2, w3, b3)

    # f32 compute path (bit-accurate vs. reference), default block_b heuristic.
    out = encoder_mlp(x, w1, b1, w2, b2, w3, b3)
    out = jax.block_until_ready(out)
    assert out.shape == (batch, output_dim), out.shape
    assert jnp.allclose(out, ref, atol=1e-5, rtol=1e-5), (
        float(jnp.max(jnp.abs(out - ref))))

    # bf16 matmul-operand path (recommended on all generations); f32 accumulation.
    out_bf16 = encoder_mlp(x, w1, b1, w2, b2, w3, b3, block_b=32,
                           compute_dtype=jnp.bfloat16)
    out_bf16 = jax.block_until_ready(out_bf16)
    assert out_bf16.shape == (batch, output_dim), out_bf16.shape
    assert jnp.allclose(out_bf16, ref, atol=3e-2, rtol=3e-2), (
        float(jnp.max(jnp.abs(out_bf16 - ref))))

    print("KERNEL_OK")
</pallas_src>

<mosaic_0001>
module attributes {stable_mosaic.version = 11 : i64} {
  func.func @_encoder_mlp_kernel(%arg0: i32, %arg1: memref<16x32xf32, #tpu.memory_space<vmem>>, %arg2: memref<32x128xf32, #tpu.memory_space<vmem>>, %arg3: memref<1x128xf32, #tpu.memory_space<vmem>>, %arg4: memref<128x128xf32, #tpu.memory_space<vmem>>, %arg5: memref<1x128xf32, #tpu.memory_space<vmem>>, %arg6: memref<128x16xf32, #tpu.memory_space<vmem>>, %arg7: memref<1x16xf32, #tpu.memory_space<vmem>>, %arg8: memref<16x16xf32, #tpu.memory_space<vmem>>) attributes {dimension_semantics = [#tpu.dimension_semantics<parallel>], iteration_bounds = array<i64: 4>, scalar_prefetch = 0 : i64, scratch_operands = 0 : i64, tpu.core_type = #tpu.core_type<tc>, window_params = [{transform_indices = @transform_0, window_bounds = array<i64: 16, 32>}, {pipeline_mode = #tpu.pipeline_mode<synchronous>, transform_indices = @transform_1, window_bounds = array<i64: 32, 128>}, {pipeline_mode = #tpu.pipeline_mode<synchronous>, transform_indices = @transform_2, window_bounds = array<i64: 1, 128>}, {pipeline_mode = #tpu.pipeline_mode<synchronous>, transform_indices = @transform_3, window_bounds = array<i64: 128, 128>}, {pipeline_mode = #tpu.pipeline_mode<synchronous>, transform_indices = @transform_4, window_bounds = array<i64: 1, 128>}, {pipeline_mode = #tpu.pipeline_mode<synchronous>, transform_indices = @transform_5, window_bounds = array<i64: 128, 16>}, {pipeline_mode = #tpu.pipeline_mode<synchronous>, transform_indices = @transform_6, window_bounds = array<i64: 1, 16>}, {transform_indices = @transform_7, window_bounds = array<i64: 16, 16>}]} {
    %c0 = arith.constant 0 : index
    %c0_0 = arith.constant 0 : index
    %0 = vector.load %arg1[%c0, %c0_0] : memref<16x32xf32, #tpu.memory_space<vmem>>, vector<16x32xf32>
    %c0_1 = arith.constant 0 : index
    %c0_2 = arith.constant 0 : index
    %1 = vector.load %arg2[%c0_1, %c0_2] : memref<32x128xf32, #tpu.memory_space<vmem>>, vector<32x128xf32>
    %cst = arith.constant dense<0.000000e+00> : vector<16x128xf32>
    %2 = tpu.matmul %0, %1, %cst {dimension_numbers = #tpu.dot_dimension_numbers<[1], [0], [0], [1], [0, 0, 1, 1], [], []>} : vector<16x32xf32>, vector<32x128xf32>, vector<16x128xf32> -> vector<16x128xf32>
    %c0_3 = arith.constant 0 : index
    %c0_4 = arith.constant 0 : index
    %3 = vector.load %arg3[%c0_3, %c0_4] : memref<1x128xf32, #tpu.memory_space<vmem>>, vector<1x128xf32>
    %4 = vector.broadcast %3 : vector<1x128xf32> to vector<16x128xf32>
    %5 = arith.addf %2, %4 : vector<16x128xf32>
    %cst_5 = arith.constant 0.000000e+00 : f32
    %6 = vector.broadcast %cst_5 : f32 to vector<16x128xf32>
    %7 = arith.maximumf %5, %6 : vector<16x128xf32>
    %c0_6 = arith.constant 0 : index
    %c0_7 = arith.constant 0 : index
    %8 = vector.load %arg4[%c0_6, %c0_7] : memref<128x128xf32, #tpu.memory_space<vmem>>, vector<128x128xf32>
    %cst_8 = arith.constant dense<0.000000e+00> : vector<16x128xf32>
    %9 = tpu.matmul %7, %8, %cst_8 {dimension_numbers = #tpu.dot_dimension_numbers<[1], [0], [0], [1], [0, 0, 1, 1], [], []>} : vector<16x128xf32>, vector<128x128xf32>, vector<16x128xf32> -> vector<16x128xf32>
    %c0_9 = arith.constant 0 : index
    %c0_10 = arith.constant 0 : index
    %10 = vector.load %arg5[%c0_9, %c0_10] : memref<1x128xf32, #tpu.memory_space<vmem>>, vector<1x128xf32>
    %11 = vector.broadcast %10 : vector<1x128xf32> to vector<16x128xf32>
    %12 = arith.addf %9, %11 : vector<16x128xf32>
    %cst_11 = arith.constant 0.000000e+00 : f32
    %13 = vector.broadcast %cst_11 : f32 to vector<16x128xf32>
    %14 = arith.maximumf %12, %13 : vector<16x128xf32>
    %c0_12 = arith.constant 0 : index
    %c0_13 = arith.constant 0 : index
    %15 = vector.load %arg6[%c0_12, %c0_13] : memref<128x16xf32, #tpu.memory_space<vmem>>, vector<128x16xf32>
    %cst_14 = arith.constant dense<0.000000e+00> : vector<16x16xf32>
    %16 = tpu.matmul %14, %15, %cst_14 {dimension_numbers = #tpu.dot_dimension_numbers<[1], [0], [0], [1], [0, 0, 1, 1], [], []>} : vector<16x128xf32>, vector<128x16xf32>, vector<16x16xf32> -> vector<16x16xf32>
    %c0_15 = arith.constant 0 : index
    %c0_16 = arith.constant 0 : index
    %17 = vector.load %arg7[%c0_15, %c0_16] : memref<1x16xf32, #tpu.memory_space<vmem>>, vector<1x16xf32>
    %18 = vector.broadcast %17 : vector<1x16xf32> to vector<16x16xf32>
    %19 = arith.addf %16, %18 : vector<16x16xf32>
    %c0_17 = arith.constant 0 : index
    %c0_18 = arith.constant 0 : index
    %20 = vector.load %arg8[%c0_17, %c0_18] : memref<16x16xf32, #tpu.memory_space<vmem>>, vector<16x16xf32>
    tpu.vector_store %arg8[%c0_17, %c0_18], %19 {strides = array<i32>} : memref<16x16xf32, #tpu.memory_space<vmem>>, vector<16x16xf32>,
    return
  }
  func.func @transform_0(%arg0: i32) -> (i32, i32) {
    %c0_i32 = arith.constant 0 : i32
    %c0_i32_0 = arith.constant 0 : i32
    return %arg0, %c0_i32 : i32, i32
  }
  func.func @transform_1(%arg0: i32) -> (i32, i32) {
    %c0_i32 = arith.constant 0 : i32
    %c0_i32_0 = arith.constant 0 : i32
    %c0_i32_1 = arith.constant 0 : i32
    return %c0_i32, %c0_i32_0 : i32, i32
  }
  func.func @transform_2(%arg0: i32) -> (i32, i32) {
    %c0_i32 = arith.constant 0 : i32
    %c0_i32_0 = arith.constant 0 : i32
    %c0_i32_1 = arith.constant 0 : i32
    return %c0_i32, %c0_i32_0 : i32, i32
  }
  func.func @transform_3(%arg0: i32) -> (i32, i32) {
    %c0_i32 = arith.constant 0 : i32
    %c0_i32_0 = arith.constant 0 : i32
    %c0_i32_1 = arith.constant 0 : i32
    return %c0_i32, %c0_i32_0 : i32, i32
  }
  func.func @transform_4(%arg0: i32) -> (i32, i32) {
    %c0_i32 = arith.constant 0 : i32
    %c0_i32_0 = arith.constant 0 : i32
    %c0_i32_1 = arith.constant 0 : i32
    return %c0_i32, %c0_i32_0 : i32, i32
  }
  func.func @transform_5(%arg0: i32) -> (i32, i32) {
    %c0_i32 = arith.constant 0 : i32
    %c0_i32_0 = arith.constant 0 : i32
    %c0_i32_1 = arith.constant 0 : i32
    return %c0_i32, %c0_i32_0 : i32, i32
  }
  func.func @transform_6(%arg0: i32) -> (i32, i32) {
    %c0_i32 = arith.constant 0 : i32
    %c0_i32_0 = arith.constant 0 : i32
    %c0_i32_1 = arith.constant 0 : i32
    return %c0_i32, %c0_i32_0 : i32, i32
  }
  func.func @transform_7(%arg0: i32) -> (i32, i32) {
    %c0_i32 = arith.constant 0 : i32
    %c0_i32_0 = arith.constant 0 : i32
    return %arg0, %c0_i32 : i32, i32
  }
}

</mosaic_0001>

<bundles_post_ra>
// kernel: encoder_mlp.1
= control target key start
LH: loop header
LB: loop body
LE: loop exit
PB: predicated region body
PF: predicated region fallthrough
CT: control target
= control target key end

     0   :  { %s903_s24 = smov 0   ;;  %s1044_s0 = inlined_call_operand.vmem [shape: f32[64,32], index: 0, kind: input, shape index: {}]   ;;  %s1045_s1 = inlined_call_operand.vmem [shape: f32[32,128], index: 1, kind: input, shape index: {}]   ;;  %s1046_s2 = inlined_call_operand.vmem [shape: f32[1,128], index: 2, kind: input, shape index: {}]   ;;  %s1047_s3 = inlined_call_operand.vmem [shape: f32[128,128], index: 3, kind: input, shape index: {}]   ;;  %s1048_s4 = inlined_call_operand.vmem [shape: f32[1,128], index: 4, kind: input, shape index: {}]   ;;  %s1049_s5 = inlined_call_operand.vmem [shape: f32[128,16], index: 5, kind: input, shape index: {}]   ;;  %s1050_s6 = inlined_call_operand.vmem [shape: f32[1,16], index: 6, kind: input, shape index: {}]   ;;  %s1051_s7 = inlined_call_operand.vmem [shape: f32[64,16], index: 7, kind: output, shape index: {}]  }
   0x1 LB: > { %s636_s25 = sadd.s32 4294967295, %s861_s24   ;;  %p640_p0 = scmp.ge.s32.totalorder %s861_s24, 1  ;;  %s861_s24 = sphi %s903_s24, %s17_s24  }
   0x2   : > { %p238_p1 = scmp.lt.s32.totalorder %s861_s24, 5 }
   0x4   : > { %p239_p2 = pnand %p640_p0, %p238_p1 }
   0x5   : > { %v284_v0 = vld [vmem:[%s1045_s1] sm:$0xff] (!%p239_p2)  ;;  %v285_v1 = vld [vmem:[%s1045_s1 + $0x8] sm:$0xff] (!%p239_p2)  ;;  %v286_v2 = vld [vmem:[%s1045_s1 + $0x10] sm:$0xff] (!%p239_p2)  ;;  %s641_s9 = sshll.u32 (!%p239_p2), %s636_s25, 1  ;;  %vm295_vm0 = vcmask (!%p239_p2), 261120   ;;  %vm577_vm1 = vcmask (!%p239_p2), 130048  }
   0x6   : > { %242 = sbr.rel (%p239_p2) target bundleno = 670 (0x29e), region = 48  ;;  %v775_v3 = vpack.c.bf16 (!%p239_p2), %v285_v1, %v284_v0  ;;  %v287_v4 = vld [vmem:[%s1045_s1 + $0x18] sm:$0xff] (!%p239_p2)  ;;  %p271_p3 = scmp.lt.s32.totalorder (!%p239_p2), %s641_s9, 7  ;;  %v379_v5 = vld [vmem:[%s1047_s3] sm:$0xff] (!%p239_p2)  ;;  %v380_v6 = vld [vmem:[%s1047_s3 + $0x8] sm:$0xff] (!%p239_p2) }
   0x7   : > { %v779_v7 = vpack.c.bf16 (!%p239_p2), %v287_v4, %v286_v2  ;;  %v783_v8 = vpack.c.bf16 (!%p239_p2), %v380_v6, %v379_v5  ;;  %v381_v9 = vld [vmem:[%s1047_s3 + $0x10] sm:$0xff] (!%p239_p2)  ;;  %v382_v10 = vld [vmem:[%s1047_s3 + $0x18] sm:$0xff] (!%p239_p2)  ;;  %v383_v12 = vld [vmem:[%s1047_s3 + $0x20] sm:$0xff] (!%p239_p2) }
   0x8   : > { %776 = vmatprep.subr.bf16.mxu0 (!%p239_p2), %v775_v3  ;;  %v787_v11 = vpack.c.bf16 (!%p239_p2), %v382_v10, %v381_v9  ;;  %v384_v13 = vld [vmem:[%s1047_s3 + $0x28] sm:$0xff] (!%p239_p2)  ;;  %v385_v16 = vld [vmem:[%s1047_s3 + $0x30] sm:$0xff] (!%p239_p2)  ;;  %v386_v17 = vld [vmem:[%s1047_s3 + $0x38] sm:$0xff] (!%p239_p2) }
   0x9   : > { %778 = vmatpush3.bf16.msra.mxu0 (!%p239_p2), %v775_v3  ;;  %784 = vmatprep.subr.bf16.mxu1 (!%p239_p2), %v783_v8  ;;  %v791_v14 = vpack.c.bf16 (!%p239_p2), %v384_v13, %v383_v12  ;;  %v795_v19 = vpack.c.bf16 (!%p239_p2), %v386_v17, %v385_v16  ;;  %v387_v20 = vld [vmem:[%s1047_s3 + $0x40] sm:$0xff] (!%p239_p2)  ;;  %v388_v21 = vld [vmem:[%s1047_s3 + $0x48] sm:$0xff] (!%p239_p2)  ;;  %v389_v23 = vld [vmem:[%s1047_s3 + $0x50] sm:$0xff] (!%p239_p2) }
   0xa   : > { %780 = vmatprep.subr.bf16.mxu0 (!%p239_p2), %v779_v7  ;;  %786 = vmatpush3.bf16.msra.mxu1 (!%p239_p2), %v783_v8  ;;  %v799_v22 = vpack.c.bf16 (!%p239_p2), %v388_v21, %v387_v20  ;;  %v390_v24 = vld [vmem:[%s1047_s3 + $0x58] sm:$0xff] (!%p239_p2)  ;;  %v391_v26 = vld [vmem:[%s1047_s3 + $0x60] sm:$0xff] (!%p239_p2)  ;;  %v392_v27 = vld [vmem:[%s1047_s3 + $0x68] sm:$0xff] (!%p239_p2) }
   0xb   : > { %788 = vmatprep.subr.bf16.mxu1 (!%p239_p2), %v787_v11  ;;  %v803_v25 = vpack.c.bf16 (!%p239_p2), %v390_v24, %v389_v23  ;;  %v807_v28 = vpack.c.bf16 (!%p239_p2), %v392_v27, %v391_v26  ;;  %v393_v29 = vld [vmem:[%s1047_s3 + $0x70] sm:$0xff] (!%p239_p2)  ;;  %v394_v30 = vld [vmem:[%s1047_s3 + $0x78] sm:$0xff] (!%p239_p2)  ;;  %v479_v32 = vld [vmem:[%s1049_s5] sm:$0xff] (!%p239_p2) }
   0xc   : > { %v811_v31 = vpack.c.bf16 (!%p239_p2), %v394_v30, %v393_v29  ;;  %v480_v33 = vld [vmem:[%s1049_s5 + $0x8] sm:$0xff] (!%p239_p2)  ;;  %v481_v34 = vld [vmem:[%s1049_s5 + $0x10] sm:$0xff] (!%p239_p2)  ;;  %v482_v36 = vld [vmem:[%s1049_s5 + $0x18] sm:$0xff] (!%p239_p2) }
   0xd   : > { %s1053_s9 = smov (!%p271_p3, %s641_s9), 7  ;;  %782 = vmatpush3.bf16.msra.mxu0 %v779_v7  ;;  %v815_v35 = vpack.c.bf16 %v480_v33, %v479_v32  ;;  %v819_v37 = vpack.c.bf16 %v482_v36, %v481_v34  ;;  %v483_v38 = vld [vmem:[%s1049_s5 + $0x20] sm:$0xff]  ;;  %v484_v39 = vld [vmem:[%s1049_s5 + $0x28] sm:$0xff]  ;;  %v485_v41 = vld [vmem:[%s1049_s5 + $0x30] sm:$0xff] }
   0xe   : > { %s642_s25 = sshll.u32 %s1053_s9, 3  ;;  %790 = vmatpush3.bf16.msra.mxu1 %v787_v11  ;;  %v823_v40 = vpack.c.bf16 %v484_v39, %v483_v38  ;;  %v486_v42 = vld [vmem:[%s1049_s5 + $0x38] sm:$0xff]  ;;  %v487_v44 = vld [vmem:[%s1049_s5 + $0x40] sm:$0xff]  ;;  %v488_v45 = vld [vmem:[%s1049_s5 + $0x48] sm:$0xff] }
   0xf   : > { %s274_s28 = scalar_lea.vmem %s1044_s0, %s642_s25  ;;  %792 = vmatprep.subr.bf16.mxu1 %v791_v14  ;;  %816 = vmatprep.subr.bf16.mxu0 %v815_v35  ;;  %v827_v43 = vpack.c.bf16 %v486_v42, %v485_v41  ;;  %v831_v46 = vpack.c.bf16 %v488_v45, %v487_v44  ;;  %v489_v47 = vld [vmem:[%s1049_s5 + $0x50] sm:$0xff]  ;;  %v490_v48 = vld [vmem:[%s1049_s5 + $0x58] sm:$0xff]  ;;  %v491_v50 = vld [vmem:[%s1049_s5 + $0x60] sm:$0xff]  ;;  %s280_s29 = scalar_lea.vmem %s1051_s7, %s642_s25 }
  0x10   : > { %v282_v15 = vld [vmem:[%s274_s28] sm:$0xff]  ;;  %v283_v18 = vld [vmem:[%s274_s28 + $0x8] sm:$0xff]  ;;  %v835_v49 = vpack.c.bf16 %v490_v48, %v489_v47  ;;  %v493_v60 = vld [vmem:[%s1049_s5 + $0x70] sm:$0xff] }
  0x11   : > { %702 = vmatprep.mubr.msk.f32.mxu0 %vm295_vm0, %v282_v15  ;;  %v492_v51 = vld [vmem:[%s1049_s5 + $0x68] sm:$0xff]  ;;  %v645_v53 = vld [vmem:[%s1046_s2] ss:$0 sm:$0xff]  ;;  %v494_v61 = vld [vmem:[%s1049_s5 + $0x78] sm:$0xff] }
  0x12   : > { %703 = vmatmul.mubr.msk.f32.vlgmr.msra.gmra.mrb[0].mxu0 %vm295_vm0, %v283_v18  ;;  %794 = vmatpush3.bf16.msra.mxu1 %v791_v14  ;;  %v839_v52 = vpack.c.bf16 %v492_v51, %v491_v50  ;;  %v843_v62 = vpack.c.bf16 %v494_v61, %v493_v60  ;;  %v648_v63 = vld [vmem:[%s1048_s4] ss:$0 sm:$0xff] }
  0x13   : > { %796 = vmatprep.subr.bf16.mxu1 %v795_v19  ;;  %818 = vmatpush3.bf16.msra.mxu0 %v815_v35  ;;  %v649_v6 = vld [vmem:[%s1050_s6] ss:$0 sm:$0xff] }
  0x14   : > { %820 = vmatprep.subr.bf16.mxu0 %v819_v37 }
  0x16   : > { %798 = vmatpush3.bf16.msra.mxu1 %v795_v19 }
  0x17   : > { %800 = vmatprep.subr.bf16.mxu1 %v799_v22  ;;  %822 = vmatpush3.bf16.msra.mxu0 %v819_v37 }
  0x18   : > { %824 = vmatprep.subr.bf16.mxu0 %v823_v40 }
  0x1a   : > { %802 = vmatpush3.bf16.msra.mxu1 %v799_v22 }
  0x1b   : > { %804 = vmatprep.subr.bf16.mxu1 %v803_v25  ;;  %826 = vmatpush3.bf16.msra.mxu0 %v823_v40 }
  0x1c   : > { %828 = vmatprep.subr.bf16.mxu0 %v827_v43 }
  0x1e   : > { %806 = vmatpush3.bf16.msra.mxu1 %v803_v25 }
  0x1f   : > { %808 = vmatprep.subr.bf16.mxu1 %v807_v28  ;;  %830 = vmatpush3.bf16.msra.mxu0 %v827_v43 }
  0x20   : > { %832 = vmatprep.subr.bf16.mxu0 %v831_v46 }
  0x22   : > { %810 = vmatpush3.bf16.msra.mxu1 %v807_v28 }
  0x23   : > { %812 = vmatprep.subr.bf16.mxu1 %v811_v31  ;;  %834 = vmatpush3.bf16.msra.mxu0 %v831_v46 }
  0x24   : > { %836 = vmatprep.subr.bf16.mxu0 %v835_v49 }
  0x26   : > { %814 = vmatpush3.bf16.msra.mxu1 %v811_v31 }
  0x27   : > { %838 = vmatpush3.bf16.msra.mxu0 %v835_v49 }
  0x28   : > { %840 = vmatprep.subr.bf16.mxu0 %v839_v52 }
  0x2b   : > { %842 = vmatpush3.bf16.msra.mxu0 %v839_v52 }
  0x2c   : > { %844 = vmatprep.subr.bf16.mxu0 %v843_v62 }
  0x2f   : > { %846 = vmatpush3.bf16.msra.mxu0 %v843_v62 }
  0xe5   : > { %v704_v54 = vpop.f32.mrb[0].mxu0 }
  0xe6   : > { %v374_v55 = vadd.f32 %v704_v54, %v645_v53  ;;  %v368_v56 = vpop.f32.mrb[1].mxu0 }
  0xe7   : > { %v369_v57 = vadd.f32 %v645_v53, %v368_v56 }
  0xe8   : > { %v378_v59 = vmax.f32 %v374_v55, 0.0 }
  0xe9   : > { %v377_v58 = vmax.f32 %v369_v57, 0.0 }
  0xeb   : > { %737 = vmatprep.mubr.f32.mxu1 %v377_v58 }
  0xec   : > { %738 = vmatmul.mubr.f32.vlgmr.msra.gmra.mrb[0].mxu1 %v378_v59 }
 0x1bf   : > { %v739_v0 = vpop.f32.mrb[0].mxu1 }
 0x1c0   : > { %v474_v1 = vadd.f32 %v739_v0, %v648_v63  ;;  %v468_v2 = vpop.f32.mrb[1].mxu1 }
 0x1c1   : > { %v469_v3 = vadd.f32 %v648_v63, %v468_v2 }
 0x1c2   : > { %v478_v5 = vmax.f32 %v474_v1, 0.0 }
 0x1c3   : > { %v477_v4 = vmax.f32 %v469_v3, 0.0 }
 0x1c5   : > { %772 = vmatprep.mubr.f32.mxu0 %v477_v4 }
 0x1c6   : > { %773 = vmatmul.mubr.f32.vlgmr.msra.gmra.mrb[2].mxu0 %v478_v5 }
 0x299   : > { %v774_v7 = vpop.f32.mrb[2].mxu0 }
 0x29a   : > { %v568_v8 = vpop.f32.mrb[3].mxu0  ;;  %v574_v10 = vadd.f32 %v774_v7, %v649_v6 }
 0x29b   : > { %v569_v9 = vadd.f32 %v649_v6, %v568_v8 }
 0x29c   : > { %579 = vst.msk [vmem:[%s280_s29 + $0x8] sm:$0xff] %vm577_vm1, %v574_v10 }
 0x29d   : > { %578 = vst.msk [vmem:[%s280_s29] sm:$0xff] %vm577_vm1, %v569_v9 }
 0x29e PF: > { %s17_s24 = sadd.s32 1, %s861_s24  }
 0x29f   : > { %p14_p4 = scmp.ge.s32.totalorder %s17_s24, 6  }
 0x2a1   :  { %16 = sbr.rel (!%p14_p4) target bundleno = 1 (0x1), region = 78 }

</bundles_post_ra>
